<compile_context>
chip_gen: v7x
topology: tpu7x:2x2x1
jax: 0.10.0
libtpu: 0.0.40
codegen_flags: <defaults>
</compile_context>

<pallas_src>
import functools

import jax
import jax.numpy as jnp
from jax.experimental import pallas as pl
from jax.experimental.pallas import tpu as pltpu

_LANE = 128


def _interaction_kernel(xd_ref, xm_ref, w_ref, out_ref, *, compute_dtype):
    """One tile_n-row tile of the bilinear interaction + sigmoid.

    xd_ref : (tile_n, size)  input dtype, cast to compute_dtype for the MXU
    xm_ref : (tile_n, size)  input dtype, cast to f32 for the VPU product
    w_ref  : (size,  size)   VMEM-resident (constant index_map), cast for MXU
    out_ref: (1, tile_n)     float32, lane-dense output row
    """
    xd = xd_ref[...].astype(compute_dtype)
    w = w_ref[...].astype(compute_dtype)
    # MXU: (tile_n, size) @ (size, size), f32 accumulation.
    interaction = jnp.dot(xd, w, preferred_element_type=jnp.float32)
    xm = xm_ref[...].astype(jnp.float32)
    # VPU multiply + XLU cross-lane row reduction.
    pre_act = jnp.sum(interaction * xm, axis=1, keepdims=True)  # (tile_n, 1)
    # Lane-dense store: relayout the small (tile_n,1) result, unmasked vst for
    # full tiles (edge tile is masked automatically by Pallas).
    out_ref[...] = jnp.transpose(jax.nn.sigmoid(pre_act)).astype(out_ref.dtype)


def _round_up(x, m):
    return ((x + m - 1) // m) * m


def _physical_vmem_bytes():
    try:
        return int(pltpu.get_tpu_info().vmem_capacity_bytes)
    except Exception:
        return 64 * 1024 * 1024  # conservative fallback (v7x per-core VMEM)


def _choose_tile_n(n, size, xd_bytes, xm_bytes, w_bytes, vmem_budget_bytes):
    """Pick tile_n targeting ~2 MiB streamed per grid step, VMEM permitting."""
    stream_row = size * (xd_bytes + xm_bytes)          # HBM bytes streamed / row
    tile = (2 * 1024 * 1024) // max(stream_row, 1)     # amortize ~0.35us/step
    # VMEM per row: double-buffered xd/xm tiles + f32 interaction/product temps.
    vmem_row = 2 * stream_row + 2 * size * 4 + 16
    fixed = 2 * size * size * w_bytes                  # resident W (2 buffers)
    avail = vmem_budget_bytes // 2 - fixed             # leave half for compiler
    if avail > vmem_row * _LANE:
        tile = min(tile, avail // vmem_row)
    else:
        tile = _LANE
        # TODO(synk): K-tile `size` (grid axis over W with an f32 accumulator)
        # when W alone no longer fits comfortably in VMEM (large size on v7x).
    tile = max(_LANE, min(4096, (tile // _LANE) * _LANE))
    tile = min(tile, _round_up(n, _LANE))              # don't tile past the data
    return int(tile)


def interaction_predictor(
    features_diseases,
    features_miRNAs,
    transformation_matrix,
    *,
    compute_dtype=jnp.float32,   # f32 default == PyTorch semantics; bf16 opt-in
    tile_n=None,
    use_pallas=None,             # None -> auto (XLA fast path for tiny inputs)
):
    """features_diseases, features_miRNAs: (N, size); W: (size, size) -> (N,)."""
    n, size = features_diseases.shape
    assert features_miRNAs.shape == (n, size)
    assert transformation_matrix.shape == (size, size)

    xd, xm, w = features_diseases, features_miRNAs, transformation_matrix

    streamed_bytes = n * size * (xd.dtype.itemsize + xm.dtype.itemsize)
    if use_pallas is None:
        # Below a few hundred KiB the pallas_call overhead dominates; a single
        # fused XLA expression wins outright.
        use_pallas = streamed_bytes >= (512 * 1024)
    if not use_pallas:
        return jax.nn.sigmoid(jnp.sum(jnp.dot(xd, w) * xm, axis=1))

    physical_vmem = _physical_vmem_bytes()
    vmem_limit = int(max(32 * 1024 * 1024, (physical_vmem * 3) // 4))
    if tile_n is None:
        tile_n = _choose_tile_n(
            n, size, xd.dtype.itemsize, xm.dtype.itemsize,
            w.dtype.itemsize, vmem_limit,
        )
    num_tiles = pl.cdiv(n, tile_n)

    cost = pl.CostEstimate(
        flops=2 * n * size * size + 2 * n * size,
        transcendentals=n,
        bytes_accessed=(
            xd.size * xd.dtype.itemsize
            + xm.size * xm.dtype.itemsize
            + w.size * w.dtype.itemsize
            + n * 4
        ),
    )

    kernel = functools.partial(_interaction_kernel, compute_dtype=compute_dtype)

    out2d = pl.pallas_call(
        kernel,
        out_shape=jax.ShapeDtypeStruct((1, n), jnp.float32),
        grid_spec=pltpu.PrefetchScalarGridSpec(
            num_scalar_prefetch=0,
            grid=(num_tiles,),
            in_specs=[
                pl.BlockSpec((tile_n, size), lambda i: (i, 0)),  # xd: streamed
                pl.BlockSpec((tile_n, size), lambda i: (i, 0)),  # xm: streamed
                pl.BlockSpec((size, size), lambda i: (0, 0)),    # W: VMEM-resident
            ],
            out_specs=pl.BlockSpec((1, tile_n), lambda i: (0, i)),  # lane-dense
        ),
        compiler_params=pltpu.CompilerParams(
            dimension_semantics=("parallel",),   # megacore sharding where supported
            vmem_limit_bytes=vmem_limit,
        ),
        cost_estimate=cost,
    )(xd, xm, w)

    return out2d.reshape(n)


if __name__ == "__main__":
    key = jax.random.PRNGKey(0)
    k_w, k_d, k_m = jax.random.split(key, 3)

    size = 32   # hidden feature size ("size" in the module __init__)
    n = 8       # number of (disease, miRNA) pairs

    transformation_matrix = jax.random.normal(k_w, (size, size), dtype=jnp.float32)
    features_diseases = jax.random.normal(k_d, (n, size), dtype=jnp.float32)
    features_miRNAs = jax.random.normal(k_m, (n, size), dtype=jnp.float32)

    # Plain-JAX reference (exact PyTorch forward semantics).
    ref = jax.nn.sigmoid(
        jnp.sum((features_diseases @ transformation_matrix) * features_miRNAs, axis=1)
    )

    # 1) Pallas kernel, exact-f32 compute (default) -- forced through Pallas so
    #    the kernel itself is exercised even at this tiny demo shape.
    out = interaction_predictor(
        features_diseases, features_miRNAs, transformation_matrix, use_pallas=True
    )
    jax.block_until_ready(out)
    assert out.shape == (n,)
    assert jnp.allclose(out, ref, atol=1e-5, rtol=1e-5)

    # 2) Opt-in bf16 MXU operands (f32 accumulate / activation); compared
    #    against a reference that uses the same bf16 MXU casting.
    out_bf16 = interaction_predictor(
        features_diseases, features_miRNAs, transformation_matrix,
        compute_dtype=jnp.bfloat16, use_pallas=True,
    )
    jax.block_until_ready(out_bf16)
    ref_bf16 = jax.nn.sigmoid(
        jnp.sum(
            jnp.dot(
                features_diseases.astype(jnp.bfloat16),
                transformation_matrix.astype(jnp.bfloat16),
                preferred_element_type=jnp.float32,
            )
            * features_miRNAs,
            axis=1,
        )
    )
    assert jnp.allclose(out_bf16, ref_bf16, atol=2e-3, rtol=2e-3)

    # 3) Auto dispatch: this tiny problem takes the fused-XLA fast path.
    out_auto = interaction_predictor(
        features_diseases, features_miRNAs, transformation_matrix
    )
    jax.block_until_ready(out_auto)
    assert jnp.allclose(out_auto, ref, atol=1e-6, rtol=1e-6)

    print("KERNEL_OK")
</pallas_src>

<mosaic_0001>
module attributes {stable_mosaic.version = 11 : i64} {
  func.func @_interaction_kernel(%arg0: i32, %arg1: memref<128x32xf32, #tpu.memory_space<vmem>>, %arg2: memref<128x32xf32, #tpu.memory_space<vmem>>, %arg3: memref<32x32xf32, #tpu.memory_space<vmem>>, %arg4: memref<1x128xf32, #tpu.memory_space<vmem>>) attributes {dimension_semantics = [#tpu.dimension_semantics<parallel>], iteration_bounds = array<i64: 1>, scalar_prefetch = 0 : i64, scratch_operands = 0 : i64, tpu.core_type = #tpu.core_type<tc>, window_params = [{transform_indices = @transform_0, window_bounds = array<i64: 128, 32>}, {transform_indices = @transform_1, window_bounds = array<i64: 128, 32>}, {pipeline_mode = #tpu.pipeline_mode<synchronous>, transform_indices = @transform_2, window_bounds = array<i64: 32, 32>}, {transform_indices = @transform_3, window_bounds = array<i64: 1, 128>}]} {
    %c0 = arith.constant 0 : index
    %c0_0 = arith.constant 0 : index
    %0 = vector.load %arg1[%c0, %c0_0] : memref<128x32xf32, #tpu.memory_space<vmem>>, vector<128x32xf32>
    %c0_1 = arith.constant 0 : index
    %c0_2 = arith.constant 0 : index
    %1 = vector.load %arg3[%c0_1, %c0_2] : memref<32x32xf32, #tpu.memory_space<vmem>>, vector<32x32xf32>
    %cst = arith.constant dense<0.000000e+00> : vector<128x32xf32>
    %2 = tpu.matmul %0, %1, %cst {dimension_numbers = #tpu.dot_dimension_numbers<[1], [0], [0], [1], [0, 0, 1, 1], [], []>} : vector<128x32xf32>, vector<32x32xf32>, vector<128x32xf32> -> vector<128x32xf32>
    %c0_3 = arith.constant 0 : index
    %c0_4 = arith.constant 0 : index
    %3 = vector.load %arg2[%c0_3, %c0_4] : memref<128x32xf32, #tpu.memory_space<vmem>>, vector<128x32xf32>
    %4 = arith.mulf %2, %3 : vector<128x32xf32>
    %cst_5 = arith.constant dense<0.000000e+00> : vector<128xf32>
    %5 = vector.multi_reduction <add>, %4, %cst_5 [1] : vector<128x32xf32> to vector<128xf32>
    %6 = vector.shape_cast %5 : vector<128xf32> to vector<128x1xf32>
    %7 = arith.negf %6 : vector<128x1xf32>
    %8 = math.exp %7 : vector<128x1xf32>
    %cst_6 = arith.constant 1.000000e+00 : f32
    %9 = vector.broadcast %cst_6 : f32 to vector<128x1xf32>
    %10 = arith.addf %9, %8 : vector<128x1xf32>
    %11 = arith.divf %9, %10 : vector<128x1xf32>
    %12 = tpu.transpose %11, [1, 0] : vector<128x1xf32> -> vector<1x128xf32>
    %c0_7 = arith.constant 0 : index
    %c0_8 = arith.constant 0 : index
    %13 = vector.load %arg4[%c0_7, %c0_8] : memref<1x128xf32, #tpu.memory_space<vmem>>, vector<1x128xf32>
    tpu.vector_store %arg4[%c0_7, %c0_8], %12 {strides = array<i32>} : memref<1x128xf32, #tpu.memory_space<vmem>>, vector<1x128xf32>,
    return
  }
  func.func @transform_0(%arg0: i32) -> (i32, i32) {
    %c0_i32 = arith.constant 0 : i32
    %c0_i32_0 = arith.constant 0 : i32
    return %arg0, %c0_i32 : i32, i32
  }
  func.func @transform_1(%arg0: i32) -> (i32, i32) {
    %c0_i32 = arith.constant 0 : i32
    %c0_i32_0 = arith.constant 0 : i32
    return %arg0, %c0_i32 : i32, i32
  }
  func.func @transform_2(%arg0: i32) -> (i32, i32) {
    %c0_i32 = arith.constant 0 : i32
    %c0_i32_0 = arith.constant 0 : i32
    %c0_i32_1 = arith.constant 0 : i32
    return %c0_i32, %c0_i32_0 : i32, i32
  }
  func.func @transform_3(%arg0: i32) -> (i32, i32) {
    %c0_i32 = arith.constant 0 : i32
    %c0_i32_0 = arith.constant 0 : i32
    return %c0_i32, %arg0 : i32, i32
  }
}

</mosaic_0001>

<bundles_post_ra>
// kernel: tpu_custom_call.1
= control target key start
LH: loop header
LB: loop body
LE: loop exit
PB: predicated region body
PF: predicated region fallthrough
CT: control target
= control target key end

     0   :  { %8 = vsyncpa [#allocation3], 0  ;;  %s877_s0 = inlined_call_operand.hbm [shape: f32[8,32], index: 0, kind: input, shape index: {}]   ;;  %s878_s1 = inlined_call_operand.hbm [shape: f32[8,32], index: 1, kind: input, shape index: {}]   ;;  %s879_s2 = inlined_call_operand.hbm [shape: f32[32,32], index: 2, kind: input, shape index: {}]   ;;  %s880_s3 = inlined_call_operand.hbm [shape: f32[1,8], index: 3, kind: output, shape index: {}]  }
   0x1   :  { %9 = vsyncpa [#allocation6], 0 }
   0x2   :  { %10 = vsyncpa [#allocation4], 0 }
   0x3   :  { %15 = vsyncadd [#allocation3], 1920  ;;  %s755_s12 = smov [#allocation2]   ;;  %s661_s16 = scalar_lea.hbm %s877_s0, 128 }
   0x4   :  { %s16_s13 = sshll.u32 %s755_s12, 4  ;;  %p662_p0 = scmp.ne.s32.totalorder %s877_s0, %s661_s16  ;;  %s17_s13 = int_to_ptr.vmem [resolvable:$true] %s16_s13 }
   0x5   :  { %p665_p1 = scmp.lt.u32.totalorder %s661_s16, %s877_s0 }
   0x7   :  { %p667_p2 = pnand %p665_p1, %p662_p0 }
   0x9   :  { %670 = shalt.err (!%p667_p2)
}
   0xa   :  { %s671_s21 = scalar_lea.vmem %s17_s13, 128  ;;  %s675_s22 = scalar_lea.vmem %s17_s13, 2048 }
   0xb   :  { %p672_p3 = scmp.ne.s32.totalorder %s17_s13, %s671_s21  ;;  %p676_p4 = scmp.lt.s32.totalorder %s17_s13, %s17_s13 }
   0xc   :  { %p677_p5 = scmp.lt.s32.totalorder %s675_s22, %s671_s21 }
   0xe   :  { %p678_p6 = por %p677_p5, %p676_p4 }
  0x10   :  { %p679_p7 = pnand %p678_p6, %p672_p3 }
  0x12   :  { %682 = shalt.err (!%p679_p7)
}
  0x13   :  { %s756_s23 = smov 128   ;;  %s757_s24 = smov 8  }
  0x14   :  { %22 = dma.hbm_to_vmem [thread:$0]  %s877_s0, 128, %s17_s13, [#allocation3], %s756_s23, %s756_s23, %s757_s24  }
  0x15   :  { %27 = vsyncadd [#allocation6], 1920  ;;  %s758_s27 = smov [#allocation5]   ;;  %s759_s29 = smov [#allocation7]  }
  0x16   :  { %s28_s28 = sshll.u32 %s758_s27, 4  ;;  %s40_s30 = sshll.u32 %s759_s29, 4  ;;  %s29_s28 = int_to_ptr.vmem [resolvable:$true] %s28_s28  ;;  %s796_s30 = int_to_ptr.vmem [resolvable:$true] %s40_s30 }
  0x17   :  { %s683_s6 = scalar_lea.hbm %s878_s1, 128 }
  0x18   :  { %p684_p8 = scmp.ne.s32.totalorder %s878_s1, %s683_s6  ;;  %p687_p9 = scmp.lt.u32.totalorder %s683_s6, %s878_s1 }
  0x1a   :  { %p689_p10 = pnand %p687_p9, %p684_p8 }
  0x1c   :  { %692 = shalt.err (!%p689_p10)
}
  0x1d   :  { %s693_s0 = scalar_lea.vmem %s29_s28, 128  ;;  %s697_s11 = scalar_lea.vmem %s29_s28, 2048 }
  0x1e   :  { %p694_p11 = scmp.ne.s32.totalorder %s29_s28, %s693_s0  ;;  %p698_p12 = scmp.lt.s32.totalorder %s29_s28, %s29_s28 }
  0x1f   :  { %p699_p13 = scmp.lt.s32.totalorder %s697_s11, %s693_s0 }
  0x21   :  { %p700_p0 = por %p699_p13, %p698_p12 }
  0x23   :  { %p701_p1 = pnand %p700_p0, %p694_p11 }
  0x25   :  { %704 = shalt.err (!%p701_p1)
}
  0x26   :  { %34 = dma.hbm_to_vmem [thread:$0]  %s878_s1, 128, %s29_s28, [#allocation6], %s756_s23, %s756_s23, %s757_s24  }
  0x27   :  { %s705_s16 = scalar_lea.hbm %s879_s2, 512 }
  0x28   :  { %p706_p2 = scmp.ne.s32.totalorder %s879_s2, %s705_s16  ;;  %p709_p3 = scmp.lt.u32.totalorder %s705_s16, %s879_s2 }
  0x2a   :  { %p711_p4 = pnand %p709_p3, %p706_p2 }
  0x2c   :  { %714 = shalt.err (!%p711_p4)
}
  0x2d   :  { %s715_s21 = scalar_lea.vmem %s796_s30, 512  ;;  %p720_p6 = scmp.lt.s32.totalorder %s796_s30, %s796_s30 }
  0x2e   :  { %p716_p5 = scmp.ne.s32.totalorder %s796_s30, %s715_s21  ;;  %p721_p7 = scmp.lt.s32.totalorder %s715_s21, %s715_s21 }
  0x30   :  { %p722_p8 = por %p721_p7, %p720_p6 }
  0x32   :  { %p723_p9 = pnand %p722_p8, %p716_p5 }
  0x34   :  { %726 = shalt.err (!%p723_p9)
}
  0x35   :  { %46 = dma.hbm_to_vmem [thread:$0]  %s879_s2, 512, %s796_s30, [#allocation6], %s756_s23, %s756_s23, %s757_s24  }
  0x36   :  { %749 = dma.done.wait [#allocation3], 2048  }
  0x37   :  { %750 = vsyncadd [#allocation3], 4294965248 }
  0x38   :  { %751 = dma.done.wait [#allocation6], 2560  }
  0x39   :  { %752 = vsyncadd [#allocation6], 4294964736  ;;  %vm76_vm0 = vcmask 261120   ;;  %v72_v0 = vld [vmem:[#allocation7] sm:$0xff]  ;;  %v73_v1 = vld [vmem:[#allocation7 + $0x8] sm:$0xff]  ;;  %s760_s2 = smov [#allocation8]  }
  0x3a   :  { %v74_v2 = vld [vmem:[#allocation7 + $0x10] sm:$0xff]  ;;  %v579_v3 = vpack.c.bf16 %v73_v1, %v72_v0  ;;  %v75_v4 = vld [vmem:[#allocation7 + $0x18] sm:$0xff]  ;;  %v56_v5 = vld [vmem:[#allocation2] sm:$0xff]  ;;  %s485_s23 = sshll.u32 %s760_s2, 4  ;;  %s486_s23 = int_to_ptr.vmem [resolvable:$true] %s485_s23 }
  0x3b   :  { %v583_v6 = vpack.c.bf16 %v75_v4, %v74_v2  ;;  %555 = vmatprep.mubr.msk.f32.mxu0 %vm76_vm0, %v56_v5  ;;  %v64_v7 = vld [vmem:[#allocation2 + $0x40] sm:$0xff]  ;;  %v57_v8 = vld [vmem:[#allocation2 + $0x8] sm:$0xff]  ;;  %v58_v10 = vld [vmem:[#allocation2 + $0x10] sm:$0xff]  ;;  %s727_s24 = scalar_lea.vmem %s486_s23, 16  ;;  %s731_s25 = scalar_lea.vmem %s486_s23, 32 }
  0x3c   :  { %580 = vmatprep.subr.bf16.mxu0 %v579_v3  ;;  %587 = vmatprep.subr.bf16.mxu1 %v579_v3  ;;  %v65_v9 = vld [vmem:[#allocation2 + $0x48] sm:$0xff]  ;;  %v66_v11 = vld [vmem:[#allocation2 + $0x50] sm:$0xff]  ;;  %v59_v12 = vld [vmem:[#allocation2 + $0x18] sm:$0xff]  ;;  %p728_p10 = scmp.ne.s32.totalorder %s486_s23, %s727_s24  ;;  %p732_p11 = scmp.lt.s32.totalorder %s486_s23, %s486_s23 }
  0x3d   :  { %582 = vmatpush3.bf16.msra.mxu0 %v579_v3  ;;  %589 = vmatpush3.bf16.msra.mxu1 %v579_v3  ;;  %v67_v13 = vld [vmem:[#allocation2 + $0x58] sm:$0xff]  ;;  %v60_v14 = vld [vmem:[#allocation2 + $0x20] sm:$0xff]  ;;  %v61_v16 = vld [vmem:[#allocation2 + $0x28] sm:$0xff]  ;;  %p733_p12 = scmp.lt.s32.totalorder %s731_s25, %s727_s24 }
  0x3e   :  { %584 = vmatprep.subr.bf16.mxu0 %v583_v6  ;;  %588 = vmatprep.subr.bf16.mxu1 %v583_v6  ;;  %v68_v15 = vld [vmem:[#allocation2 + $0x60] sm:$0xff]  ;;  %v69_v17 = vld [vmem:[#allocation2 + $0x68] sm:$0xff]  ;;  %v62_v18 = vld [vmem:[#allocation2 + $0x30] sm:$0xff] }
  0x3f   :  { %567 = vmatprep.mubr.msk.f32.mxu1 %vm76_vm0, %v64_v7  ;;  %v70_v19 = vld [vmem:[#allocation2 + $0x70] sm:$0xff]  ;;  %v63_v20 = vld [vmem:[#allocation2 + $0x38] sm:$0xff]  ;;  %v271_v22 = vld [vmem:[#allocation5 + $0x8] sm:$0xff]  ;;  %p734_p13 = por %p733_p12, %p732_p11 }
  0x40   :  { %v71_v21 = vld [vmem:[#allocation2 + $0x78] sm:$0xff]  ;;  %v270_v24 = vld [vmem:[#allocation5] sm:$0xff]  ;;  %v272_v33 = vld [vmem:[#allocation5 + $0x10] sm:$0xff] }
  0x41   :  { %586 = vmatpush3.bf16.msra.mxu0 %v583_v6  ;;  %590 = vmatpush3.bf16.msra.mxu1 %v583_v6  ;;  %v278_v29 = vld [vmem:[#allocation5 + $0x40] sm:$0xff]  ;;  %v273_v32 = vld [vmem:[#allocation5 + $0x18] sm:$0xff]  ;;  %v275_v42 = vld [vmem:[#allocation5 + $0x28] sm:$0xff]  ;;  %p735_p0 = pnand %p734_p13, %p728_p10 }
  0x42   :  { %v274_v43 = vld [vmem:[#allocation5 + $0x20] sm:$0xff]  ;;  %v277_v53 = vld [vmem:[#allocation5 + $0x38] sm:$0xff]  ;;  %v276_v54 = vld [vmem:[#allocation5 + $0x30] sm:$0xff] }
  0x43   :  { %v280_v63 = vld [vmem:[#allocation5 + $0x50] sm:$0xff]  ;;  %v279_v0 = vld [vmem:[#allocation5 + $0x48] sm:$0xff]  ;;  %v282_v4 = vld [vmem:[#allocation5 + $0x60] sm:$0xff] }
  0x44   :  { %556 = vmatmul.mubr.msk.f32.vlgmr.msra.gmra.mrb[0].mxu0 %vm76_vm0, %v57_v8  ;;  %568 = vmatmul.mubr.msk.f32.vlgmr.msra.gmra.mrb[0].mxu1 %vm76_vm0, %v65_v9  ;;  %v281_v5 = vld [vmem:[#allocation5 + $0x58] sm:$0xff] }
  0x45   :  { %558 = vmatprep.mubr.msk.f32.mxu0 %vm76_vm0, %v58_v10  ;;  %570 = vmatprep.mubr.msk.f32.mxu1 %vm76_vm0, %v66_v11  ;;  %v284_v10 = vld [vmem:[#allocation5 + $0x70] sm:$0xff]  ;;  %v283_v11 = vld [vmem:[#allocation5 + $0x68] sm:$0xff] }
  0x48   :  { %559 = vmatmul.mubr.msk.f32.gmra.mrb[2].mxu0 %vm76_vm0, %v59_v12  ;;  %571 = vmatmul.mubr.msk.f32.gmra.mrb[2].mxu1 %vm76_vm0, %v67_v13 }
  0x49   :  { %561 = vmatprep.mubr.msk.f32.mxu0 %vm76_vm0, %v60_v14  ;;  %573 = vmatprep.mubr.msk.f32.mxu1 %vm76_vm0, %v68_v15 }
  0x4c   :  { %562 = vmatmul.mubr.msk.f32.gmra.mrb[4].mxu0 %vm76_vm0, %v61_v16  ;;  %574 = vmatmul.mubr.msk.f32.gmra.mrb[4].mxu1 %vm76_vm0, %v69_v17  ;;  %v285_v17 = vld [vmem:[#allocation5 + $0x78] sm:$0xff] }
  0x4d   :  { %564 = vmatprep.mubr.msk.f32.mxu0 %vm76_vm0, %v62_v18  ;;  %576 = vmatprep.mubr.msk.f32.mxu1 %vm76_vm0, %v70_v19 }
  0x50   :  { %565 = vmatmul.mubr.msk.f32.gmra.mrb[6].mxu0 %vm76_vm0, %v63_v20  ;;  %577 = vmatmul.mubr.msk.f32.gmra.mrb[6].mxu1 %vm76_vm0, %v71_v21 }
 0x117   :  { %v557_v23 = vpop.f32.mrb[0].mxu0  ;;  %v569_v25 = vpop.f32.mrb[0].mxu1 }
 0x118   :  { %v287_v26 = vmul.f32 %v557_v23, %v271_v22  ;;  %v191_v27 = vpop.f32.mrb[1].mxu0  ;;  %v231_v28 = vpop.f32.mrb[1].mxu1  ;;  %v295_v6 = vmul.f32 %v569_v25, %v279_v0 }
 0x119   :  { %v286_v30 = vmul.f32 %v270_v24, %v191_v27  ;;  %v294_v37 = vmul.f32 %v278_v29, %v231_v28 }
 0x11a   :  { %v305_v31 = vsel %vm76_vm0, %v287_v26, 0.0  ;;  %v329_v12 = vsel %vm76_vm0, %v295_v6, 0.0 }
 0x11b   :  { %306 = vadd.xlane.f32.xlu0 %v305_v31  ;;  %v560_v34 = vpop.f32.mrb[2].mxu0  ;;  %v572_v35 = vpop.f32.mrb[2].mxu1  ;;  %v302_v41 = vsel %vm76_vm0, %v286_v30, 0.0  ;;  %v326_v48 = vsel %vm76_vm0, %v294_v37, 0.0 }
 0x11c   :  { %v201_v36 = vpop.f32.mrb[3].mxu0  ;;  %v241_v38 = vpop.f32.mrb[3].mxu1  ;;  %v289_v39 = vmul.f32 %v560_v34, %v273_v32  ;;  %v297_v9 = vmul.f32 %v572_v35, %v281_v5 }
 0x11d   :  { %v288_v40 = vmul.f32 %v272_v33, %v201_v36  ;;  %v296_v2 = vmul.f32 %v280_v63, %v241_v38 }
 0x11e   :  { %v311_v50 = vsel %vm76_vm0, %v289_v39, 0.0  ;;  %v335_v15 = vsel %vm76_vm0, %v297_v9, 0.0 }
 0x11f   :  { %303 = vadd.xlane.f32.xlu0 %v302_v41  ;;  %v308_v44 = vsel %vm76_vm0, %v288_v40, 0.0  ;;  %v563_v45 = vpop.f32.mrb[4].mxu0  ;;  %v575_v46 = vpop.f32.mrb[4].mxu1  ;;  %v332_v7 = vsel %vm76_vm0, %v296_v2, 0.0 }
 0x120   :  { %309 = vadd.xlane.f32.xlu1 %v308_v44  ;;  %v211_v47 = vpop.f32.mrb[5].mxu0  ;;  %v251_v49 = vpop.f32.mrb[5].mxu1  ;;  %v291_v51 = vmul.f32 %v563_v45, %v275_v42  ;;  %v299_v16 = vmul.f32 %v575_v46, %v283_v11 }
 0x121   :  { %v290_v52 = vmul.f32 %v274_v43, %v211_v47  ;;  %v298_v8 = vmul.f32 %v282_v4, %v251_v49 }
 0x122   :  { %v317_v60 = vsel %vm76_vm0, %v291_v51, 0.0  ;;  %v341_v19 = vsel %vm76_vm0, %v299_v16, 0.0 }
 0x123   :  { %v566_v55 = vpop.f32.mrb[6].mxu0  ;;  %327 = vadd.xlane.f32.xlu0 %v326_v48  ;;  %v578_v56 = vpop.f32.mrb[6].mxu1  ;;  %v314_v57 = vsel %vm76_vm0, %v290_v52, 0.0  ;;  %v338_v13 = vsel %vm76_vm0, %v298_v8, 0.0 }
 0x124   :  { %312 = vadd.xlane.f32.xlu1 %v311_v50  ;;  %v221_v58 = vpop.f32.mrb[7].mxu0  ;;  %v261_v59 = vpop.f32.mrb[7].mxu1  ;;  %v293_v61 = vmul.f32 %v566_v55, %v277_v53  ;;  %v301_v20 = vmul.f32 %v578_v56, %v285_v17 }
 0x125   :  { %v292_v62 = vmul.f32 %v276_v54, %v221_v58  ;;  %v300_v14 = vmul.f32 %v284_v10, %v261_v59 }
 0x126   :  { %v323_v3 = vsel %vm76_vm0, %v293_v61, 0.0  ;;  %v347_v21 = vsel %vm76_vm0, %v301_v20, 0.0 }
 0x127   :  { %315 = vadd.xlane.f32.xlu0 %v314_v57  ;;  %v320_v1 = vsel %vm76_vm0, %v292_v62, 0.0  ;;  %v344_v18 = vsel %vm76_vm0, %v300_v14, 0.0 }
 0x128   :  { %318 = vadd.xlane.f32.xlu1 %v317_v60 }
 0x12b   :  { %321 = vadd.xlane.f32.xlu0 %v320_v1 }
 0x12c   :  { %324 = vadd.xlane.f32.xlu1 %v323_v3 }
 0x12f   :  { %333 = vadd.xlane.f32.xlu0 %v332_v7 }
 0x130   :  { %330 = vadd.xlane.f32.xlu1 %v329_v12 }
 0x133   :  { %339 = vadd.xlane.f32.xlu0 %v338_v13 }
 0x134   :  { %336 = vadd.xlane.f32.xlu1 %v335_v15 }
 0x137   :  { %345 = vadd.xlane.f32.xlu0 %v344_v18 }
 0x138   :  { %342 = vadd.xlane.f32.xlu1 %v341_v19 }
 0x13c   :  { %348 = vadd.xlane.f32.xlu1 %v347_v21 }
 0x1a8   :  { %v307_v22 = vpop.xlane.xlu0 %306 }
 0x1a9   :  { %v512_v23 = vmul.f32 -1.442695, %v307_v22 }
 0x1ab   :  { %597 = vpow2.f32 %v512_v23 }
 0x1ac   :  { %v304_v24 = vpop.xlane.xlu0 %303 }
 0x1ad   :  { %v511_v25 = vmul.f32 -1.442695, %v304_v24  ;;  %v310_v26 = vpop.xlane.xlu1 %309 }
 0x1ae   :  { %v513_v27 = vmul.f32 -1.442695, %v310_v26 }
 0x1af   :  { %599 = vpow2.f32 %v511_v25 }
 0x1b0   :  { %v328_v28 = vpop.xlane.xlu0 %327  ;;  %601 = vpow2.f32 %v513_v27 }
 0x1b1   :  { %v313_v29 = vpop.xlane.xlu1 %312  ;;  %v519_v50 = vmul.f32 -1.442695, %v328_v28 }
 0x1b2   :  { %v514_v30 = vmul.f32 -1.442695, %v313_v29 }
 0x1b4   :  { %v316_v31 = vpop.xlane.xlu0 %315  ;;  %603 = vpow2.f32 %v514_v30 }
 0x1b5   :  { %v515_v32 = vmul.f32 -1.442695, %v316_v31  ;;  %v598_v33 = vpop.eup %597  ;;  %v319_v36 = vpop.xlane.xlu1 %318 }
 0x1b6   :  { %v516_v39 = vmul.f32 -1.442695, %v319_v36  ;;  %v399_v40 = vadd.f32 1.0, %v598_v33 }
 0x1b7   :  { %605 = vpow2.f32 %v515_v32 }
 0x1b8   :  { %v322_v37 = vpop.xlane.xlu0 %321 }
 0x1b9   :  { %v600_v34 = vpop.eup %599  ;;  %v517_v41 = vmul.f32 -1.442695, %v322_v37  ;;  %v325_v44 = vpop.xlane.xlu1 %324 }
 0x1ba   :  { %v398_v35 = vadd.f32 1.0, %v600_v34  ;;  %v602_v38 = vpop.eup %601  ;;  %v518_v46 = vmul.f32 -1.442695, %v325_v44 }
 0x1bb   :  { %v400_v42 = vadd.f32 1.0, %v602_v38 }
 0x1bc   :  { %607 = vrcp.f32 %v398_v35  ;;  %v334_v54 = vpop.xlane.xlu0 %333 }
 0x1bd   :  { %609 = vpow2.f32 %v516_v39  ;;  %v331_v51 = vpop.xlane.xlu1 %330  ;;  %v521_v59 = vmul.f32 -1.442695, %v334_v54 }
 0x1be   :  { %611 = vrcp.f32 %v399_v40  ;;  %v604_v43 = vpop.eup %603  ;;  %v520_v56 = vmul.f32 -1.442695, %v331_v51 }
 0x1bf   :  { %613 = vpow2.f32 %v517_v41  ;;  %v401_v47 = vadd.f32 1.0, %v604_v43 }
 0x1c0   :  { %615 = vrcp.f32 %v400_v42  ;;  %v340_v0 = vpop.xlane.xlu0 %339 }
 0x1c1   :  { %v606_v45 = vpop.eup %605  ;;  %617 = vpow2.f32 %v518_v46  ;;  %v337_v61 = vpop.xlane.xlu1 %336  ;;  %v523_v5 = vmul.f32 -1.442695, %v340_v0 }
 0x1c2   :  { %v402_v49 = vadd.f32 1.0, %v606_v45  ;;  %619 = vrcp.f32 %v401_v47  ;;  %v522_v1 = vmul.f32 -1.442695, %v337_v61 }
 0x1c4   :  { %621 = vrcp.f32 %v402_v49  ;;  %v346_v10 = vpop.xlane.xlu0 %345 }
 0x1c5   :  { %623 = vpow2.f32 %v519_v50  ;;  %v343_v7 = vpop.xlane.xlu1 %342  ;;  %v525_v15 = vmul.f32 -1.442695, %v346_v10 }
 0x1c6   :  { %v608_v48 = vpop.eup %607  ;;  %625 = vpow2.f32 %v520_v56  ;;  %v524_v12 = vmul.f32 -1.442695, %v343_v7 }
 0x1c7   :  { %446 = vxpose.xlu0.b32.start [1/16] (narrow) %v608_v48, 8  ;;  %v610_v52 = vpop.eup %609 }
 0x1c8   :  { %v612_v53 = vpop.eup %611  ;;  %v403_v58 = vadd.f32 1.0, %v610_v52 }
 0x1c9   :  { %v614_v55 = vpop.eup %613  ;;  %v349_v17 = vpop.xlane.xlu1 %348 }
 0x1ca   :  { %v616_v57 = vpop.eup %615  ;;  %v404_v60 = vadd.f32 1.0, %v614_v55  ;;  %627 = vrcp.f32 %v403_v58  ;;  %v526_v21 = vmul.f32 -1.442695, %v349_v17 }
 0x1cb   :  { %447 = vxpose.xlu0.b32.cont [2/16] (narrow) %v612_v53, 8  ;;  %v618_v62 = vpop.eup %617  ;;  %629 = vpow2.f32 %v521_v59 }
 0x1cc   :  { %v620_v63 = vpop.eup %619  ;;  %631 = vrcp.f32 %v404_v60  ;;  %v405_v3 = vadd.f32 1.0, %v618_v62 }
 0x1cd   :  { %633 = vpow2.f32 %v522_v1 }
 0x1ce   :  { %v622_v2 = vpop.eup %621  ;;  %635 = vrcp.f32 %v405_v3 }
 0x1cf   :  { %448 = vxpose.xlu0.b32.cont [3/16] (narrow) %v616_v57, 8  ;;  %v624_v4 = vpop.eup %623  ;;  %637 = vpow2.f32 %v523_v5 }
 0x1d0   :  { %v406_v6 = vadd.f32 1.0, %v624_v4  ;;  %v626_v8 = vpop.eup %625 }
 0x1d1   :  { %v407_v14 = vadd.f32 1.0, %v626_v8 }
 0x1d2   :  { %639 = vrcp.f32 %v406_v6 }
 0x1d3   :  { %449 = vxpose.xlu0.b32.cont [4/16] (narrow) %v620_v63, 8  ;;  %641 = vpow2.f32 %v524_v12 }
 0x1d4   :  { %v628_v9 = vpop.eup %627  ;;  %643 = vrcp.f32 %v407_v14 }
 0x1d5   :  { %v630_v11 = vpop.eup %629  ;;  %645 = vpow2.f32 %v525_v15 }
 0x1d6   :  { %v632_v13 = vpop.eup %631  ;;  %v408_v16 = vadd.f32 1.0, %v630_v11 }
 0x1d7   :  { %450 = vxpose.xlu0.b32.cont [5/16] (narrow) %v622_v2, 8  ;;  %v634_v18 = vpop.eup %633 }
 0x1d8   :  { %v636_v19 = vpop.eup %635  ;;  %647 = vrcp.f32 %v408_v16  ;;  %v409_v22 = vadd.f32 1.0, %v634_v18 }
 0x1d9   :  { %v638_v20 = vpop.eup %637  ;;  %649 = vpow2.f32 %v526_v21 }
 0x1da   :  { %v410_v24 = vadd.f32 1.0, %v638_v20  ;;  %651 = vrcp.f32 %v409_v22 }
 0x1db   :  { %451 = vxpose.xlu0.b32.cont [6/16] (narrow) %v628_v9, 8 }
 0x1dc   :  { %v640_v23 = vpop.eup %639  ;;  %653 = vrcp.f32 %v410_v24 }
 0x1dd   :  { %v642_v25 = vpop.eup %641 }
 0x1de   :  { %v644_v26 = vpop.eup %643  ;;  %v411_v29 = vadd.f32 1.0, %v642_v25 }
 0x1df   :  { %452 = vxpose.xlu0.b32.cont [7/16] (narrow) %v632_v13, 8  ;;  %v646_v27 = vpop.eup %645 }
 0x1e0   :  { %v412_v30 = vadd.f32 1.0, %v646_v27  ;;  %655 = vrcp.f32 %v411_v29 }
 0x1e2   :  { %v648_v28 = vpop.eup %647  ;;  %657 = vrcp.f32 %v412_v30 }
 0x1e3   :  { %453 = vxpose.xlu0.b32.cont [8/16] (narrow) %v636_v19, 8  ;;  %v650_v31 = vpop.eup %649 }
 0x1e4   :  { %v652_v32 = vpop.eup %651  ;;  %v413_v34 = vadd.f32 1.0, %v650_v31 }
 0x1e6   :  { %v654_v33 = vpop.eup %653  ;;  %659 = vrcp.f32 %v413_v34 }
 0x1e7   :  { %454 = vxpose.xlu0.b32.cont [9/16] (narrow) %v640_v23, 8 }
 0x1ea   :  { %v656_v35 = vpop.eup %655 }
 0x1eb   :  { %455 = vxpose.xlu0.b32.cont [10/16] (narrow) %v644_v26, 8 }
 0x1ec   :  { %v658_v36 = vpop.eup %657 }
 0x1ef   :  { %456 = vxpose.xlu0.b32.cont [11/16] (narrow) %v648_v28, 8 }
 0x1f0   :  { %v660_v37 = vpop.eup %659 }
 0x1f3   :  { %457 = vxpose.xlu0.b32.cont [12/16] (narrow) %v652_v32, 8 }
 0x1f7   :  { %458 = vxpose.xlu0.b32.cont [13/16] (narrow) %v654_v33, 8 }
 0x1fb   :  { %459 = vxpose.xlu0.b32.cont [14/16] (narrow) %v656_v35, 8 }
 0x1ff   :  { %460 = vxpose.xlu0.b32.cont [15/16] (narrow) %v658_v36, 8 }
 0x203   :  { %461 = vxpose.xlu0.b32.end [16/16] (narrow) %v660_v37, 8 }
 0x247   :  { %v462_v38 = vpop.trf.xlu0 }
 0x248   :  { %478 = vst [vmem:[#allocation8] sm:$0x1] %v462_v38 }
 0x249   :  { %738 = shalt.err (!%p735_p0)
}
 0x24a   :  { %s739_s28 = scalar_lea.hbm %s880_s3, 16 }
 0x24b   :  { %p740_p1 = scmp.ne.s32.totalorder %s880_s3, %s739_s28  ;;  %p743_p2 = scmp.lt.u32.totalorder %s739_s28, %s880_s3 }
 0x24d   :  { %p745_p3 = pnand %p743_p2, %p740_p1 }
 0x24f   :  { %748 = shalt.err (!%p745_p3)
}
 0x250   :  { %488 = dma.vmem_to_hbm [thread:$0]  %s486_s23, 16, %s880_s3, [#allocation4]  }
 0x251   :  { %753 = dma.done.wait [#allocation4], 16  }
 0x252   :  { %754 = vsyncadd [#allocation4], 4294967280 }
 0x253   :  { %492 = vsyncpa [#allocation3], 1 }
 0x254   :  { %493 = vsyncpa [#allocation6], 1 }
 0x255   :  { %494 = vsyncpa [#allocation4], 1 }

</bundles_post_ra>
